<compile_context>
chip_gen: v5e
topology: v5e:2x2
jax: 0.10.0
libtpu: 0.0.40
codegen_flags: <defaults>
</compile_context>

<pallas_src>
import math
from functools import partial

import jax
import jax.numpy as jnp
from jax import lax
from jax.experimental import pallas as pl
from jax.experimental.pallas import tpu as pltpu


_VMEM_LIMIT = 48 * 1024 * 1024  # budget below v7x's 64 MiB per TensorCore
_LN_EPS = 1e-5


def _tile_m(M, max_tile=512):
    """Row tile: full array if small, else largest multiple-of-8 divisor <= max_tile."""
    if M <= max_tile:
        return M
    for t in range(max_tile, 7, -8):
        if M % t == 0:
            return t
    return M  # fallback: single block


def _layernorm_f32(z, g, b, eps):
    mu = jnp.mean(z, axis=-1, keepdims=True)
    var = jnp.mean((z - mu) ** 2, axis=-1, keepdims=True)  # biased var == torch LN
    return (z - mu) * lax.rsqrt(var + eps) * g + b


# --------------------------- fused QKV projection ---------------------------

def _qkv_kernel(x_ref, w_ref, b_ref, o_ref):
    acc = jnp.dot(x_ref[...].astype(jnp.bfloat16), w_ref[...],
                  preferred_element_type=jnp.float32)
    o_ref[...] = (acc + b_ref[...]).astype(o_ref.dtype)


def fused_qkv(x2d, wqkv_bf16, bqkv):
    """x2d:[M,D] @ wqkv:[D,3D] + bqkv -> [M,3D] (q | k | v along columns)."""
    M, D = x2d.shape
    N = wqkv_bf16.shape[1]
    tm = _tile_m(M)
    return pl.pallas_call(
        _qkv_kernel,
        out_shape=jax.ShapeDtypeStruct((M, N), x2d.dtype),
        grid=(M // tm,),
        in_specs=[
            pl.BlockSpec((tm, D), lambda i: (i, 0)),
            pl.BlockSpec((D, N), lambda i: (0, 0)),
            pl.BlockSpec((1, N), lambda i: (0, 0)),
        ],
        out_specs=pl.BlockSpec((tm, N), lambda i: (i, 0)),
        compiler_params=pltpu.CompilerParams(
            dimension_semantics=("parallel",),
            vmem_limit_bytes=_VMEM_LIMIT),
    )(x2d, wqkv_bf16, bqkv.reshape(1, N))


# ------------- fused attention + out-projection + residual + LN -------------

def _attn_block_kernel(x_ref, qkv_ref, wo_ref, bo_ref, g_ref, be_ref,
                       o_ref, *maybe_attn, n_heads, scale, eps, store_attn):
    L, D = x_ref.shape
    dk = D // n_heads
    qkv = qkv_ref[...]                       # (L, 3D) f32
    acc = jnp.zeros((L, D), jnp.float32)     # Wo-projected attention output
    for h in range(n_heads):                 # unrolled at trace time
        qh = qkv[:, h * dk:(h + 1) * dk].astype(jnp.bfloat16)
        kh = qkv[:, D + h * dk:D + (h + 1) * dk].astype(jnp.bfloat16)
        vh = qkv[:, 2 * D + h * dk:2 * D + (h + 1) * dk].astype(jnp.bfloat16)
        # q @ k^T via contracting dims (no materialized transpose).
        s = lax.dot_general(qh, kh, (((1,), (1,)), ((), ())),
                            preferred_element_type=jnp.float32) * scale
        m = jnp.max(s, axis=-1, keepdims=True)
        p = jnp.exp(s - m)
        denom = jnp.sum(p, axis=-1, keepdims=True)
        p = p * pl.reciprocal(denom, approx=True)
        if store_attn:
            maybe_attn[0][h, :, :] = p.astype(maybe_attn[0].dtype)
        oh = jnp.dot(p.astype(jnp.bfloat16), vh,
                     preferred_element_type=jnp.float32)          # (L, dk)
        woh = wo_ref[h * dk:(h + 1) * dk, :]                       # (dk, D) bf16
        acc = acc + jnp.dot(oh.astype(jnp.bfloat16), woh,
                            preferred_element_type=jnp.float32)
    # residual + LayerNorm (norm1)
    z = x_ref[...].astype(jnp.float32) + acc + bo_ref[...]
    o_ref[...] = _layernorm_f32(z, g_ref[...], be_ref[...], eps).astype(o_ref.dtype)


def attention_block(x, qkv, wo_bf16, bo, gamma, beta, *, n_heads,
                    output_attention=True, eps=_LN_EPS):
    """x:[B,L,D], qkv:[B,L,3D] -> LayerNorm(x + MHA(x) @ Wo + bo) and attn maps."""
    B, L, D = x.shape
    dk = D // n_heads
    kernel = partial(_attn_block_kernel, n_heads=n_heads,
                     scale=1.0 / math.sqrt(dk), eps=eps,
                     store_attn=output_attention)
    x1_shape = jax.ShapeDtypeStruct((B, L, D), x.dtype)
    x1_spec = pl.BlockSpec((None, L, D), lambda b: (b, 0, 0))
    if output_attention:
        out_shape = (x1_shape,
                     jax.ShapeDtypeStruct((B, n_heads, L, L), jnp.float32))
        out_specs = (x1_spec,
                     pl.BlockSpec((None, n_heads, L, L), lambda b: (b, 0, 0, 0)))
    else:
        out_shape = x1_shape
        out_specs = x1_spec
    res = pl.pallas_call(
        kernel,
        out_shape=out_shape,
        grid=(B,),
        in_specs=[
            pl.BlockSpec((None, L, D), lambda b: (b, 0, 0)),
            pl.BlockSpec((None, L, 3 * D), lambda b: (b, 0, 0)),
            pl.BlockSpec((D, D), lambda b: (0, 0)),
            pl.BlockSpec((1, D), lambda b: (0, 0)),
            pl.BlockSpec((1, D), lambda b: (0, 0)),
            pl.BlockSpec((1, D), lambda b: (0, 0)),
        ],
        out_specs=out_specs,
        compiler_params=pltpu.CompilerParams(
            dimension_semantics=("parallel",),
            vmem_limit_bytes=_VMEM_LIMIT),
    )(x, qkv, wo_bf16, bo.reshape(1, D), gamma.reshape(1, D), beta.reshape(1, D))
    if output_attention:
        return res[0], res[1]
    return res, None


# ------------------- fused FFN + residual + LayerNorm -----------------------

def _ffn_ln_kernel(x_ref, w1_ref, b1_ref, w2_ref, b2_ref, g_ref, be_ref,
                   o_ref, *, eps):
    x = x_ref[...].astype(jnp.float32)
    h = jnp.dot(x.astype(jnp.bfloat16), w1_ref[...],
                preferred_element_type=jnp.float32) + b1_ref[...]
    h = jnp.maximum(h, 0.0)  # ReLU  # TODO(synk): some Informer configs use GELU.
    y = jnp.dot(h.astype(jnp.bfloat16), w2_ref[...],
                preferred_element_type=jnp.float32) + b2_ref[...]
    z = x + y
    o_ref[...] = _layernorm_f32(z, g_ref[...], be_ref[...], eps).astype(o_ref.dtype)


def ffn_add_ln(x2d, w1_bf16, b1, w2_bf16, b2, gamma, beta, eps=_LN_EPS):
    """norm2(x + conv2(relu(conv1(x)))) with kernel_size=1 convs as matmuls."""
    M, D = x2d.shape
    F = w1_bf16.shape[1]
    tm = _tile_m(M)
    kernel = partial(_ffn_ln_kernel, eps=eps)
    return pl.pallas_call(
        kernel,
        out_shape=jax.ShapeDtypeStruct((M, D), x2d.dtype),
        grid=(M // tm,),
        in_specs=[
            pl.BlockSpec((tm, D), lambda i: (i, 0)),
            pl.BlockSpec((D, F), lambda i: (0, 0)),
            pl.BlockSpec((1, F), lambda i: (0, 0)),
            pl.BlockSpec((F, D), lambda i: (0, 0)),
            pl.BlockSpec((1, D), lambda i: (0, 0)),
            pl.BlockSpec((1, D), lambda i: (0, 0)),
            pl.BlockSpec((1, D), lambda i: (0, 0)),
        ],
        out_specs=pl.BlockSpec((tm, D), lambda i: (i, 0)),
        compiler_params=pltpu.CompilerParams(
            dimension_semantics=("parallel",),
            vmem_limit_bytes=_VMEM_LIMIT),
    )(x2d, w1_bf16, b1.reshape(1, F), w2_bf16, b2.reshape(1, D),
      gamma.reshape(1, D), beta.reshape(1, D))


# ----------------------------- final LayerNorm ------------------------------

def _ln_kernel(x_ref, g_ref, b_ref, o_ref, *, eps):
    z = x_ref[...].astype(jnp.float32)
    o_ref[...] = _layernorm_f32(z, g_ref[...], b_ref[...], eps).astype(o_ref.dtype)


def layernorm(x2d, gamma, beta, eps=_LN_EPS):
    M, D = x2d.shape
    tm = _tile_m(M)
    kernel = partial(_ln_kernel, eps=eps)
    return pl.pallas_call(
        kernel,
        out_shape=jax.ShapeDtypeStruct((M, D), x2d.dtype),
        grid=(M // tm,),
        in_specs=[pl.BlockSpec((tm, D), lambda i: (i, 0)),
                  pl.BlockSpec((1, D), lambda i: (0, 0)),
                  pl.BlockSpec((1, D), lambda i: (0, 0))],
        out_specs=pl.BlockSpec((tm, D), lambda i: (i, 0)),
        compiler_params=pltpu.CompilerParams(dimension_semantics=("parallel",)),
    )(x2d, gamma.reshape(1, D), beta.reshape(1, D))


# ----------------------------- model wrapper -------------------------------

def init_encoder_params(key, n_layers, d_model, d_ff):
    params = []
    for _ in range(n_layers):
        keys = jax.random.split(key, 5)
        key = keys[0]
        scale = 0.02
        p = {
            # wqkv == concat([Wq.T, Wk.T, Wv.T], axis=1) of the torch Linear weights
            "wqkv": scale * jax.random.normal(keys[1], (d_model, 3 * d_model), jnp.float32),
            "bqkv": jnp.zeros((3 * d_model,), jnp.float32),
            "wo": scale * jax.random.normal(keys[2], (d_model, d_model), jnp.float32),
            "bo": jnp.zeros((d_model,), jnp.float32),
            "g1": jnp.ones((d_model,), jnp.float32),
            "be1": jnp.zeros((d_model,), jnp.float32),
            "w_ff1": scale * jax.random.normal(keys[3], (d_model, d_ff), jnp.float32),
            "b_ff1": jnp.zeros((d_ff,), jnp.float32),
            "w_ff2": scale * jax.random.normal(keys[4], (d_ff, d_model), jnp.float32),
            "b_ff2": jnp.zeros((d_model,), jnp.float32),
            "g2": jnp.ones((d_model,), jnp.float32),
            "be2": jnp.zeros((d_model,), jnp.float32),
        }
        params.append(p)
    norm = {"g": jnp.ones((d_model,), jnp.float32),
            "b": jnp.zeros((d_model,), jnp.float32)}
    return params, norm


def encoder_layer_forward(x, p, n_heads, output_attention=True):
    B, L, D = x.shape
    M = B * L
    x2d = x.reshape(M, D)

    # one wide projection: [M, D] @ [D, 3D]  (bf16 operands, f32 accumulate)
    qkv = fused_qkv(x2d, p["wqkv"].astype(jnp.bfloat16), p["bqkv"])
    qkv3 = qkv.reshape(B, L, 3 * D)          # free row-major reshape

    # attention + Wo projection + residual + norm1, heads handled in-kernel
    x1, attn = attention_block(x, qkv3, p["wo"].astype(jnp.bfloat16), p["bo"],
                               p["g1"], p["be1"], n_heads=n_heads,
                               output_attention=output_attention)

    # FFN (k=1 convs) + residual + norm2, fused
    out2d = ffn_add_ln(x1.reshape(M, D),
                       p["w_ff1"].astype(jnp.bfloat16), p["b_ff1"],
                       p["w_ff2"].astype(jnp.bfloat16), p["b_ff2"],
                       p["g2"], p["be2"])
    return out2d.reshape(B, L, D), attn


def encoder_forward(x, layer_params, norm_params, n_heads, attn_mask=None,
                    output_attention=True):
    # conv_layers is None -> plain stacking of attn layers, then final norm.
    # TODO(synk): ConvLayer (Conv1d k=3 circular + BatchNorm1d + ELU + MaxPool)
    # distilling branch not instantiated (conv_layers=None in this config).
    # TODO(synk): attn_mask is not supported (attn_mask=None path only).
    attns = []
    for p in layer_params:
        x, attn = encoder_layer_forward(x, p, n_heads,
                                        output_attention=output_attention)
        attns.append(attn)
    B, L, D = x.shape
    x = layernorm(x.reshape(B * L, D),
                  norm_params["g"], norm_params["b"]).reshape(B, L, D)
    return x, attns


# --------------------------------- main -------------------------------------

if __name__ == "__main__":
    B, L, D, H, D_FF, N_LAYERS = 2, 8, 32, 2, 64, 2

    key = jax.random.PRNGKey(0)
    k_x, k_p = jax.random.split(key)
    x = jax.random.normal(k_x, (B, L, D), jnp.float32)
    layer_params, norm_params = init_encoder_params(k_p, N_LAYERS, D, D_FF)

    out, attns = encoder_forward(x, layer_params, norm_params, n_heads=H,
                                 output_attention=True)
    jax.block_until_ready(out)
    for a in attns:
        jax.block_until_ready(a)

    assert out.shape == (B, L, D)
    assert len(attns) == N_LAYERS and attns[0].shape == (B, H, L, L)
    print("KERNEL_OK")
</pallas_src>

<mosaic_0001>
module attributes {stable_mosaic.version = 11 : i64} {
  func.func @_qkv_kernel(%arg0: i32, %arg1: memref<16x32xf32, #tpu.memory_space<vmem>>, %arg2: memref<32x96xbf16, #tpu.memory_space<vmem>>, %arg3: memref<1x96xf32, #tpu.memory_space<vmem>>, %arg4: memref<16x96xf32, #tpu.memory_space<vmem>>) attributes {dimension_semantics = [#tpu.dimension_semantics<parallel>], iteration_bounds = array<i64: 1>, scalar_prefetch = 0 : i64, scratch_operands = 0 : i64, tpu.core_type = #tpu.core_type<tc>, window_params = [{transform_indices = @transform_0, window_bounds = array<i64: 16, 32>}, {pipeline_mode = #tpu.pipeline_mode<synchronous>, transform_indices = @transform_1, window_bounds = array<i64: 32, 96>}, {pipeline_mode = #tpu.pipeline_mode<synchronous>, transform_indices = @transform_2, window_bounds = array<i64: 1, 96>}, {transform_indices = @transform_3, window_bounds = array<i64: 16, 96>}]} {
    %c0 = arith.constant 0 : index
    %c0_0 = arith.constant 0 : index
    %0 = vector.load %arg1[%c0, %c0_0] : memref<16x32xf32, #tpu.memory_space<vmem>>, vector<16x32xf32>
    %1 = arith.truncf %0 : vector<16x32xf32> to vector<16x32xbf16>
    %c0_1 = arith.constant 0 : index
    %c0_2 = arith.constant 0 : index
    %2 = vector.load %arg2[%c0_1, %c0_2] : memref<32x96xbf16, #tpu.memory_space<vmem>>, vector<32x96xbf16>
    %cst = arith.constant dense<0.000000e+00> : vector<16x96xf32>
    %3 = tpu.matmul %1, %2, %cst {dimension_numbers = #tpu.dot_dimension_numbers<[1], [0], [0], [1], [0, 0, 1, 1], [], []>} : vector<16x32xbf16>, vector<32x96xbf16>, vector<16x96xf32> -> vector<16x96xf32>
    %c0_3 = arith.constant 0 : index
    %c0_4 = arith.constant 0 : index
    %4 = vector.load %arg3[%c0_3, %c0_4] : memref<1x96xf32, #tpu.memory_space<vmem>>, vector<1x96xf32>
    %5 = vector.broadcast %4 : vector<1x96xf32> to vector<16x96xf32>
    %6 = arith.addf %3, %5 : vector<16x96xf32>
    %c0_5 = arith.constant 0 : index
    %c0_6 = arith.constant 0 : index
    %7 = vector.load %arg4[%c0_5, %c0_6] : memref<16x96xf32, #tpu.memory_space<vmem>>, vector<16x96xf32>
    tpu.vector_store %arg4[%c0_5, %c0_6], %6 {strides = array<i32>} : memref<16x96xf32, #tpu.memory_space<vmem>>, vector<16x96xf32>,
    return
  }
  func.func @transform_0(%arg0: i32) -> (i32, i32) {
    %c0_i32 = arith.constant 0 : i32
    %c0_i32_0 = arith.constant 0 : i32
    return %arg0, %c0_i32 : i32, i32
  }
  func.func @transform_1(%arg0: i32) -> (i32, i32) {
    %c0_i32 = arith.constant 0 : i32
    %c0_i32_0 = arith.constant 0 : i32
    %c0_i32_1 = arith.constant 0 : i32
    return %c0_i32, %c0_i32_0 : i32, i32
  }
  func.func @transform_2(%arg0: i32) -> (i32, i32) {
    %c0_i32 = arith.constant 0 : i32
    %c0_i32_0 = arith.constant 0 : i32
    %c0_i32_1 = arith.constant 0 : i32
    return %c0_i32, %c0_i32_0 : i32, i32
  }
  func.func @transform_3(%arg0: i32) -> (i32, i32) {
    %c0_i32 = arith.constant 0 : i32
    %c0_i32_0 = arith.constant 0 : i32
    return %arg0, %c0_i32 : i32, i32
  }
}

</mosaic_0001>

<bundles_post_ra>
// kernel: tpu_custom_call.1
= control target key start
LH: loop header
LB: loop body
LE: loop exit
PB: predicated region body
PF: predicated region fallthrough
CT: control target
= control target key end

     0   :  { %8 = vsyncpa [#allocation3], 0  ;;  %s254_s0 = inlined_call_operand.hbm [shape: f32[16,32], index: 0, kind: input, shape index: {}]   ;;  %s255_s1 = inlined_call_operand.hbm [shape: bf16[32,96], index: 1, kind: input, shape index: {}]   ;;  %s256_s2 = inlined_call_operand.vmem [shape: f32[1,96], index: 2, kind: input, shape index: {}]   ;;  %s257_s3 = inlined_call_operand.hbm [shape: f32[16,96], index: 3, kind: output, shape index: {}]  }
   0x1   :  { %9 = vsyncpa [#allocation6], 0 }
   0x2   :  { %10 = vsyncpa [#allocation4], 0  ;;  %s15_s14 = sshll.u32 %s254_s0, 4  ;;  %s209_s15 = smov [#allocation2]   ;;  %s16_s14 = int_to_ptr.hbm [resolvable:$true] %s15_s14 }
   0x3   :  { %s17_s16 = sshll.u32 %s209_s15, 4  ;;  %s28_s19 = sshll.u32 %s255_s1, 4  ;;  %s18_s16 = int_to_ptr.vmem [resolvable:$true] %s17_s16  ;;  %s29_s19 = int_to_ptr.hbm [resolvable:$true] %s28_s19 }
   0x4   :  { %s210_s20 = smov 128   ;;  %s211_s21 = smov 8  }
   0x5   :  { %23 = dma.hbm_to_vmem [thread:$0]  %s16_s14, 256, %s18_s16, [#allocation3], %s210_s20, %s210_s20, %s211_s21  }
   0x6   :  { %s212_s22 = smov [#allocation5]   ;;  %s213_s24 = smov 64  }
   0x7   :  { %s30_s23 = sshll.u32 %s212_s22, 4  ;;  %s214_s0 = smov 4   ;;  %s31_s23 = int_to_ptr.vmem [resolvable:$true] %s30_s23 }
   0x8   :  { %36 = dma.hbm_to_vmem [thread:$0]  %s29_s19, 256, %s31_s23, [#allocation6], %s213_s24, %s213_s24, %s214_s0  }
   0x9   :  { %203 = dma.done.wait [#allocation3], 256  }
   0xa   :  { %204 = vsyncadd [#allocation3], 4294967040 }
   0xb   :  { %205 = dma.done.wait [#allocation6], 256  }
   0xc   :  { %206 = vsyncadd [#allocation6], 4294967040  ;;  %v122_v0 = vld [vmem:[#allocation5 + $0x8] sm:$0xff]  ;;  %v121_v1 = vld [vmem:[#allocation5] sm:$0xff]  ;;  %vm71_vm0 = vcmask 261120   ;;  %vm89_vm1 = vcmask 785408  }
   0xd   :  { %81 = vmatpush.bf16.msra.mxu0 %v122_v0  ;;  %v48_v2 = vld [vmem:[#allocation2] sm:$0xff]  ;;  %v49_v3 = vld [vmem:[#allocation2 + $0x8] sm:$0xff]  ;;  %s215_s26 = smov [#allocation7]   ;;  %s98_s30 = sshll.u32 %s257_s3, 4  ;;  %s99_s30 = int_to_ptr.hbm [resolvable:$true] %s98_s30 }
   0xe   :  { %v50_v4 = vpack.c.bf16 %v49_v3, %v48_v2  ;;  %v130_v5 = vld [vmem:[%s256_s2] ss:$0 sm:$0xff]  ;;  %s96_s27 = sshll.u32 %s215_s26, 4  ;;  %s97_s27 = int_to_ptr.vmem [resolvable:$true] %s96_s27 }
  0x11   :  { %82 = vmatpush.bf16.msra.mxu0 %v121_v1 }
  0x14   :  { %120 = vmatmul.msk.bf16.vlgmr.msra.gmra.mxu0 %vm71_vm0, %v50_v4 }
  0x91   :  { %v84_v6 = vpop.f32.mrf.mxu0 }
  0x92   :  { %v85_v7 = vadd.f32 %v130_v5, %v84_v6 }
  0x94   :  { %90 = vst.msk [vmem:[#allocation7] sm:$0xff] %vm89_vm1, %v85_v7 }
  0x99   :  { %v86_v8 = vpop.f32.mrf.mxu0 }
  0x9a   :  { %v87_v9 = vadd.f32 %v130_v5, %v86_v8 }
  0x9c   :  { %91 = vst.msk [vmem:[#allocation7 + $0x8] sm:$0xff] %vm89_vm1, %v87_v9 }
  0x9d   :  { %104 = dma.vmem_to_hbm [thread:$0]  %s97_s27, 256, %s99_s30, [#allocation4], %s210_s20, %s210_s20, %s211_s21  }
  0x9e   :  { %207 = dma.done.wait [#allocation4], 256  }
  0x9f   :  { %208 = vsyncadd [#allocation4], 4294967040 }
  0xa0   :  { %109 = vsyncpa [#allocation3], 1 }
  0xa1   :  { %110 = vsyncpa [#allocation6], 1 }
  0xa2   :  { %111 = vsyncpa [#allocation4], 1 }

</bundles_post_ra>
